<compile_context>
chip_gen: v7x
topology: tpu7x:2x2x1
jax: 0.10.0
libtpu: 0.0.40
codegen_flags: <defaults>
</compile_context>

<pallas_src>
import functools

import jax
import jax.numpy as jnp
from jax.experimental import pallas as pl
from jax.experimental.pallas import tpu as pltpu

HIDDEN = 256


def _critic_kernel(s_ref, a_ref, w1s_ref, w1a_ref, b1_ref,
                   w2_ref, b2_ref, w3_ref, b3_ref, out_ref):
    # s_ref: [TB, state_dim] bf16, a_ref: [TB, action_dim] bf16
    # Layer 1: split-K matmul (equivalent to concat(s, a) @ W1), f32 accumulate.
    h1 = (jnp.dot(s_ref[...], w1s_ref[...], preferred_element_type=jnp.float32)
          + jnp.dot(a_ref[...], w1a_ref[...], preferred_element_type=jnp.float32)
          + b1_ref[...])
    h1 = jnp.maximum(h1, 0.0)                                   # ReLU in f32 (VPU)

    # Layer 2: bf16 MXU matmul, f32 accumulate.
    h2 = jnp.dot(h1.astype(jnp.bfloat16), w2_ref[...],
                 preferred_element_type=jnp.float32) + b2_ref[...]
    h2 = jnp.maximum(h2, 0.0)

    # Layer 3 (256 -> 1): broadcast multiply + lane reduction instead of an
    # N=1 MXU matmul.  w3 is stored lane-dense as (1, 256).
    q = jnp.sum(h2 * w3_ref[...], axis=-1, keepdims=True) + b3_ref[...]
    out_ref[...] = q.astype(out_ref.dtype)                      # [TB, 1]


def _round_up(x, m):
    return ((x + m - 1) // m) * m


def _pad_rows(x, n_rows):
    pad = n_rows - x.shape[0]
    if pad == 0:
        return x
    return jnp.pad(x, ((0, pad), (0, 0)))


def ddpg_critic_forward(s, a, params, *, batch_tile=512):
    """Replicates DDPGCritic.forward semantics (dim glue in plain JAX)."""
    # torch dim-handling glue
    if s.ndim == 1:
        s = s[None, :]
    if a.ndim == 0:
        a = a[None, None]
    if a.ndim == 1:
        a = a[:, None]

    w1s, w1a, b1, w2, b2, w3, b3 = params
    B, state_dim = s.shape
    action_dim = a.shape[1]

    # bf16 activations for the MXU (weights already stored bf16 / f32 as needed)
    s_bf = s.astype(jnp.bfloat16)
    a_bf = a.astype(jnp.bfloat16)

    # Batch tile: multiple of 8 rows, capped at batch_tile.
    tb = min(batch_tile, _round_up(B, 8))
    b_pad = _round_up(B, tb)
    s_bf = _pad_rows(s_bf, b_pad)
    a_bf = _pad_rows(a_bf, b_pad)
    grid = (b_pad // tb,)

    resident = lambda shape: pl.BlockSpec(shape, lambda i: (0,) * len(shape))

    flops = 2 * b_pad * (state_dim * HIDDEN + action_dim * HIDDEN
                         + HIDDEN * HIDDEN + HIDDEN)
    bytes_accessed = (s_bf.size * 2 + a_bf.size * 2
                      + sum(int(p.size) * p.dtype.itemsize for p in params)
                      + b_pad * 4)

    out = pl.pallas_call(
        _critic_kernel,
        out_shape=jax.ShapeDtypeStruct((b_pad, 1), jnp.float32),
        grid=grid,
        in_specs=[
            pl.BlockSpec((tb, state_dim), lambda i: (i, 0)),     # s tile (pipelined)
            pl.BlockSpec((tb, action_dim), lambda i: (i, 0)),    # a tile (pipelined)
            resident(w1s.shape), resident(w1a.shape), resident(b1.shape),
            resident(w2.shape), resident(b2.shape),
            resident(w3.shape), resident(b3.shape),
        ],
        out_specs=pl.BlockSpec((tb, 1), lambda i: (i, 0)),
        compiler_params=pltpu.CompilerParams(
            dimension_semantics=("parallel",)),
        cost_estimate=pl.CostEstimate(
            flops=flops, transcendentals=0, bytes_accessed=bytes_accessed),
    )(s_bf, a_bf, w1s, w1a, b1, w2, b2, w3, b3)
    return out[:B]


def init_params(key, state_dim, action_dim):
    """Deterministic synthetic init (shapes match nn.Linear in the module)."""
    k = jax.random.split(key, 6)
    # Layer-1 weight is stored as [in, out] and pre-split along the input dim
    # into the s-part and a-part (so the kernel never needs concat(s, a)).
    w1 = jax.random.normal(k[0], (state_dim + action_dim, HIDDEN), jnp.float32) * 0.05
    w1s = w1[:state_dim].astype(jnp.bfloat16)
    w1a = w1[state_dim:].astype(jnp.bfloat16)
    b1 = jax.random.normal(k[1], (1, HIDDEN), jnp.float32) * 0.05
    w2 = (jax.random.normal(k[2], (HIDDEN, HIDDEN), jnp.float32) * 0.05
          ).astype(jnp.bfloat16)
    b2 = jax.random.normal(k[3], (1, HIDDEN), jnp.float32) * 0.05
    # Final layer weight stored lane-dense as (1, 256), kept in f32 (VPU path).
    w3 = jax.random.normal(k[4], (1, HIDDEN), jnp.float32) * 0.05
    b3 = jax.random.normal(k[5], (1, 1), jnp.float32) * 0.05
    return (w1s, w1a, b1, w2, b2, w3, b3)


def _dim_glue(s, a):
    if s.ndim == 1:
        s = s[None, :]
    if a.ndim == 0:
        a = a[None, None]
    if a.ndim == 1:
        a = a[:, None]
    return s, a


def reference_forward_f32(s, a, params):
    """Pure-JAX f32 reference matching the original torch module semantics."""
    s, a = _dim_glue(s, a)
    w1s, w1a, b1, w2, b2, w3, b3 = params
    w1 = jnp.concatenate([w1s, w1a], axis=0).astype(jnp.float32)
    sa = jnp.concatenate([s, a], axis=1).astype(jnp.float32)
    x = jnp.maximum(sa @ w1 + b1, 0.0)
    x = jnp.maximum(x @ w2.astype(jnp.float32) + b2, 0.0)
    return x @ w3.T + b3


def reference_forward_bf16(s, a, params):
    """Pure-JAX reference with the kernel's exact precision strategy."""
    s, a = _dim_glue(s, a)
    w1s, w1a, b1, w2, b2, w3, b3 = params
    s_bf = s.astype(jnp.bfloat16)
    a_bf = a.astype(jnp.bfloat16)
    h1 = (jnp.dot(s_bf, w1s, preferred_element_type=jnp.float32)
          + jnp.dot(a_bf, w1a, preferred_element_type=jnp.float32) + b1)
    h1 = jnp.maximum(h1, 0.0)
    h2 = jnp.dot(h1.astype(jnp.bfloat16), w2,
                 preferred_element_type=jnp.float32) + b2
    h2 = jnp.maximum(h2, 0.0)
    return jnp.sum(h2 * w3, axis=-1, keepdims=True) + b3


if __name__ == "__main__":
    key = jax.random.PRNGKey(0)
    k_s, k_a, k_p, k_s2, k_a2 = jax.random.split(key, 5)

    batch, state_dim, action_dim = 2, 16, 4
    s = jax.random.normal(k_s, (batch, state_dim), jnp.float32)
    a = jax.random.normal(k_a, (batch, action_dim), jnp.float32)
    params = init_params(k_p, state_dim, action_dim)

    # Small-batch path (single grid step, batch padded to a multiple of 8).
    q = jax.block_until_ready(ddpg_critic_forward(s, a, params))
    assert q.shape == (batch, 1), q.shape
    q_bf_ref = reference_forward_bf16(s, a, params)
    q_f32_ref = reference_forward_f32(s, a, params)
    assert jnp.allclose(q, q_bf_ref, atol=1e-3, rtol=1e-3), (q, q_bf_ref)
    assert jnp.allclose(q, q_f32_ref, atol=5e-2, rtol=5e-2), (q, q_f32_ref)

    # Larger batch exercising a multi-step (pipelined, parallel) grid.
    batch2 = 256
    s2 = jax.random.normal(k_s2, (batch2, state_dim), jnp.float32)
    a2 = jax.random.normal(k_a2, (batch2, action_dim), jnp.float32)
    q2 = jax.block_until_ready(
        ddpg_critic_forward(s2, a2, params, batch_tile=128))
    assert q2.shape == (batch2, 1), q2.shape
    q2_bf_ref = reference_forward_bf16(s2, a2, params)
    assert jnp.allclose(q2, q2_bf_ref, atol=1e-3, rtol=1e-3), (q2, q2_bf_ref)

    print("KERNEL_OK")
</pallas_src>

<mosaic_0001>
module attributes {stable_mosaic.version = 11 : i64} {
  func.func @_critic_kernel(%arg0: i32, %arg1: memref<8x16xbf16, #tpu.memory_space<vmem>>, %arg2: memref<8x4xbf16, #tpu.memory_space<vmem>>, %arg3: memref<16x256xbf16, #tpu.memory_space<vmem>>, %arg4: memref<4x256xbf16, #tpu.memory_space<vmem>>, %arg5: memref<1x256xf32, #tpu.memory_space<vmem>>, %arg6: memref<256x256xbf16, #tpu.memory_space<vmem>>, %arg7: memref<1x256xf32, #tpu.memory_space<vmem>>, %arg8: memref<1x256xf32, #tpu.memory_space<vmem>>, %arg9: memref<1x1xf32, #tpu.memory_space<vmem>>, %arg10: memref<8x1xf32, #tpu.memory_space<vmem>>) attributes {dimension_semantics = [#tpu.dimension_semantics<parallel>], iteration_bounds = array<i64: 1>, scalar_prefetch = 0 : i64, scratch_operands = 0 : i64, tpu.core_type = #tpu.core_type<tc>, window_params = [{transform_indices = @transform_0, window_bounds = array<i64: 8, 16>}, {transform_indices = @transform_1, window_bounds = array<i64: 8, 4>}, {pipeline_mode = #tpu.pipeline_mode<synchronous>, transform_indices = @transform_2, window_bounds = array<i64: 16, 256>}, {pipeline_mode = #tpu.pipeline_mode<synchronous>, transform_indices = @transform_3, window_bounds = array<i64: 4, 256>}, {pipeline_mode = #tpu.pipeline_mode<synchronous>, transform_indices = @transform_4, window_bounds = array<i64: 1, 256>}, {pipeline_mode = #tpu.pipeline_mode<synchronous>, transform_indices = @transform_5, window_bounds = array<i64: 256, 256>}, {pipeline_mode = #tpu.pipeline_mode<synchronous>, transform_indices = @transform_6, window_bounds = array<i64: 1, 256>}, {pipeline_mode = #tpu.pipeline_mode<synchronous>, transform_indices = @transform_7, window_bounds = array<i64: 1, 256>}, {pipeline_mode = #tpu.pipeline_mode<synchronous>, transform_indices = @transform_8, window_bounds = array<i64: 1, 1>}, {transform_indices = @transform_9, window_bounds = array<i64: 8, 1>}]} {
    %c0 = arith.constant 0 : index
    %c0_0 = arith.constant 0 : index
    %0 = vector.load %arg1[%c0, %c0_0] : memref<8x16xbf16, #tpu.memory_space<vmem>>, vector<8x16xbf16>
    %c0_1 = arith.constant 0 : index
    %c0_2 = arith.constant 0 : index
    %1 = vector.load %arg3[%c0_1, %c0_2] : memref<16x256xbf16, #tpu.memory_space<vmem>>, vector<16x256xbf16>
    %cst = arith.constant dense<0.000000e+00> : vector<8x256xf32>
    %2 = tpu.matmul %0, %1, %cst {dimension_numbers = #tpu.dot_dimension_numbers<[1], [0], [0], [1], [0, 0, 1, 1], [], []>} : vector<8x16xbf16>, vector<16x256xbf16>, vector<8x256xf32> -> vector<8x256xf32>
    %c0_3 = arith.constant 0 : index
    %c0_4 = arith.constant 0 : index
    %3 = vector.load %arg2[%c0_3, %c0_4] : memref<8x4xbf16, #tpu.memory_space<vmem>>, vector<8x4xbf16>
    %c0_5 = arith.constant 0 : index
    %c0_6 = arith.constant 0 : index
    %4 = vector.load %arg4[%c0_5, %c0_6] : memref<4x256xbf16, #tpu.memory_space<vmem>>, vector<4x256xbf16>
    %cst_7 = arith.constant dense<0.000000e+00> : vector<8x256xf32>
    %5 = tpu.matmul %3, %4, %cst_7 {dimension_numbers = #tpu.dot_dimension_numbers<[1], [0], [0], [1], [0, 0, 1, 1], [], []>} : vector<8x4xbf16>, vector<4x256xbf16>, vector<8x256xf32> -> vector<8x256xf32>
    %6 = arith.addf %2, %5 : vector<8x256xf32>
    %c0_8 = arith.constant 0 : index
    %c0_9 = arith.constant 0 : index
    %7 = vector.load %arg5[%c0_8, %c0_9] : memref<1x256xf32, #tpu.memory_space<vmem>>, vector<1x256xf32>
    %8 = vector.broadcast %7 : vector<1x256xf32> to vector<8x256xf32>
    %9 = arith.addf %6, %8 : vector<8x256xf32>
    %cst_10 = arith.constant 0.000000e+00 : f32
    %10 = vector.broadcast %cst_10 : f32 to vector<8x256xf32>
    %11 = arith.maximumf %9, %10 : vector<8x256xf32>
    %12 = arith.truncf %11 : vector<8x256xf32> to vector<8x256xbf16>
    %c0_11 = arith.constant 0 : index
    %c0_12 = arith.constant 0 : index
    %13 = vector.load %arg6[%c0_11, %c0_12] : memref<256x256xbf16, #tpu.memory_space<vmem>>, vector<256x256xbf16>
    %cst_13 = arith.constant dense<0.000000e+00> : vector<8x256xf32>
    %14 = tpu.matmul %12, %13, %cst_13 {dimension_numbers = #tpu.dot_dimension_numbers<[1], [0], [0], [1], [0, 0, 1, 1], [], []>} : vector<8x256xbf16>, vector<256x256xbf16>, vector<8x256xf32> -> vector<8x256xf32>
    %c0_14 = arith.constant 0 : index
    %c0_15 = arith.constant 0 : index
    %15 = vector.load %arg7[%c0_14, %c0_15] : memref<1x256xf32, #tpu.memory_space<vmem>>, vector<1x256xf32>
    %16 = vector.broadcast %15 : vector<1x256xf32> to vector<8x256xf32>
    %17 = arith.addf %14, %16 : vector<8x256xf32>
    %cst_16 = arith.constant 0.000000e+00 : f32
    %18 = vector.broadcast %cst_16 : f32 to vector<8x256xf32>
    %19 = arith.maximumf %17, %18 : vector<8x256xf32>
    %c0_17 = arith.constant 0 : index
    %c0_18 = arith.constant 0 : index
    %20 = vector.load %arg8[%c0_17, %c0_18] : memref<1x256xf32, #tpu.memory_space<vmem>>, vector<1x256xf32>
    %21 = vector.broadcast %20 : vector<1x256xf32> to vector<8x256xf32>
    %22 = arith.mulf %19, %21 : vector<8x256xf32>
    %cst_19 = arith.constant dense<0.000000e+00> : vector<8xf32>
    %23 = vector.multi_reduction <add>, %22, %cst_19 [1] : vector<8x256xf32> to vector<8xf32>
    %24 = vector.shape_cast %23 : vector<8xf32> to vector<8x1xf32>
    %c0_20 = arith.constant 0 : index
    %c0_21 = arith.constant 0 : index
    %25 = vector.load %arg9[%c0_20, %c0_21] : memref<1x1xf32, #tpu.memory_space<vmem>>, vector<1x1xf32>
    %26 = vector.broadcast %25 : vector<1x1xf32> to vector<8x1xf32>
    %27 = arith.addf %24, %26 : vector<8x1xf32>
    %c0_22 = arith.constant 0 : index
    %c0_23 = arith.constant 0 : index
    %28 = vector.load %arg10[%c0_22, %c0_23] : memref<8x1xf32, #tpu.memory_space<vmem>>, vector<8x1xf32>
    tpu.vector_store %arg10[%c0_22, %c0_23], %27 {strides = array<i32>} : memref<8x1xf32, #tpu.memory_space<vmem>>, vector<8x1xf32>,
    return
  }
  func.func @transform_0(%arg0: i32) -> (i32, i32) {
    %c0_i32 = arith.constant 0 : i32
    %c0_i32_0 = arith.constant 0 : i32
    return %arg0, %c0_i32 : i32, i32
  }
  func.func @transform_1(%arg0: i32) -> (i32, i32) {
    %c0_i32 = arith.constant 0 : i32
    %c0_i32_0 = arith.constant 0 : i32
    return %arg0, %c0_i32 : i32, i32
  }
  func.func @transform_2(%arg0: i32) -> (i32, i32) {
    %c0_i32 = arith.constant 0 : i32
    %c0_i32_0 = arith.constant 0 : i32
    %c0_i32_1 = arith.constant 0 : i32
    return %c0_i32, %c0_i32_0 : i32, i32
  }
  func.func @transform_3(%arg0: i32) -> (i32, i32) {
    %c0_i32 = arith.constant 0 : i32
    %c0_i32_0 = arith.constant 0 : i32
    %c0_i32_1 = arith.constant 0 : i32
    return %c0_i32, %c0_i32_0 : i32, i32
  }
  func.func @transform_4(%arg0: i32) -> (i32, i32) {
    %c0_i32 = arith.constant 0 : i32
    %c0_i32_0 = arith.constant 0 : i32
    %c0_i32_1 = arith.constant 0 : i32
    return %c0_i32, %c0_i32_0 : i32, i32
  }
  func.func @transform_5(%arg0: i32) -> (i32, i32) {
    %c0_i32 = arith.constant 0 : i32
    %c0_i32_0 = arith.constant 0 : i32
    %c0_i32_1 = arith.constant 0 : i32
    return %c0_i32, %c0_i32_0 : i32, i32
  }
  func.func @transform_6(%arg0: i32) -> (i32, i32) {
    %c0_i32 = arith.constant 0 : i32
    %c0_i32_0 = arith.constant 0 : i32
    %c0_i32_1 = arith.constant 0 : i32
    return %c0_i32, %c0_i32_0 : i32, i32
  }
  func.func @transform_7(%arg0: i32) -> (i32, i32) {
    %c0_i32 = arith.constant 0 : i32
    %c0_i32_0 = arith.constant 0 : i32
    %c0_i32_1 = arith.constant 0 : i32
    return %c0_i32, %c0_i32_0 : i32, i32
  }
  func.func @transform_8(%arg0: i32) -> (i32, i32) {
    %c0_i32 = arith.constant 0 : i32
    %c0_i32_0 = arith.constant 0 : i32
    %c0_i32_1 = arith.constant 0 : i32
    return %c0_i32, %c0_i32_0 : i32, i32
  }
  func.func @transform_9(%arg0: i32) -> (i32, i32) {
    %c0_i32 = arith.constant 0 : i32
    %c0_i32_0 = arith.constant 0 : i32
    return %arg0, %c0_i32 : i32, i32
  }
}

</mosaic_0001>

<bundles_post_ra>
// kernel: tpu_custom_call.1
= control target key start
LH: loop header
LB: loop body
LE: loop exit
PB: predicated region body
PF: predicated region fallthrough
CT: control target
= control target key end

     0   :  { %s736_s0 = inlined_call_operand.hbm [shape: bf16[8,16], index: 0, kind: input, shape index: {}]   ;;  %s737_s1 = inlined_call_operand.vmem [shape: bf16[8,4], index: 1, kind: input, shape index: {}]   ;;  %s738_s2 = inlined_call_operand.vmem [shape: bf16[16,256], index: 2, kind: input, shape index: {}]   ;;  %s739_s3 = inlined_call_operand.vmem [shape: bf16[4,256], index: 3, kind: input, shape index: {}]   ;;  %s740_s4 = inlined_call_operand.vmem [shape: f32[1,256], index: 4, kind: input, shape index: {}]   ;;  %s741_s5 = inlined_call_operand.hbm [shape: bf16[256,256], index: 5, kind: input, shape index: {}]   ;;  %s742_s6 = inlined_call_operand.vmem [shape: f32[1,256], index: 6, kind: input, shape index: {}]   ;;  %s743_s7 = inlined_call_operand.vmem [shape: f32[1,256], index: 7, kind: input, shape index: {}]   ;;  %s744_s8 = inlined_call_operand.<no memory space> [shape: f32[1,1], index: 8, kind: input, shape index: {}]   ;;  %s745_s9 = inlined_call_operand.vmem [shape: f32[8,1], index: 9, kind: output, shape index: {}]  }
   0x1   :  { %v14_v0 = vstv %s744_s8 }
   0x2   :  { %15 = vst [vmem:[#allocation2] sm:$0x1] %v14_v0 }
   0x3   :  { %16 = vsyncpa [#allocation4], 0 }
   0x4   :  { %17 = vsyncpa [#allocation6], 0  ;;  %s623_s11 = smov [#allocation3]   ;;  %s624_s13 = smov [#allocation5]  }
   0x5   :  { %s24_s12 = sshll.u32 %s623_s11, 4  ;;  %s41_s14 = sshll.u32 %s624_s13, 4  ;;  %s25_s12 = int_to_ptr.vmem [resolvable:$true] %s24_s12  ;;  %s681_s14 = int_to_ptr.vmem [resolvable:$true] %s41_s14 }
   0x6   :  { %s575_s17 = scalar_lea.hbm %s736_s0, 64 }
   0x7   :  { %p576_p0 = scmp.ne.s32.totalorder %s736_s0, %s575_s17  ;;  %p579_p1 = scmp.lt.u32.totalorder %s575_s17, %s736_s0 }
   0x9   :  { %p581_p2 = pnand %p579_p1, %p576_p0 }
   0xb   :  { %584 = shalt.err (!%p581_p2)
}
   0xc   :  { %s585_s21 = scalar_lea.vmem %s25_s12, 64  ;;  %p590_p4 = scmp.lt.s32.totalorder %s25_s12, %s25_s12 }
   0xd   :  { %p586_p3 = scmp.ne.s32.totalorder %s25_s12, %s585_s21  ;;  %p591_p5 = scmp.lt.s32.totalorder %s585_s21, %s585_s21 }
   0xf   :  { %p592_p6 = por %p591_p5, %p590_p4 }
  0x11   :  { %p593_p7 = pnand %p592_p6, %p586_p3 }
  0x13   :  { %596 = shalt.err (!%p593_p7)
}
  0x14   :  { %27 = dma.hbm_to_vmem [thread:$0]  %s736_s0, 64, %s25_s12, [#allocation4]  }
  0x15   :  { %s597_s26 = scalar_lea.hbm %s741_s5, 4096 }
  0x16   :  { %p598_p8 = scmp.ne.s32.totalorder %s741_s5, %s597_s26  ;;  %p601_p9 = scmp.lt.u32.totalorder %s597_s26, %s741_s5 }
  0x18   :  { %p603_p10 = pnand %p601_p9, %p598_p8 }
  0x1a   :  { %606 = shalt.err (!%p603_p10)
}
  0x1b   :  { %s607_s10 = scalar_lea.vmem %s681_s14, 4096  ;;  %p612_p12 = scmp.lt.s32.totalorder %s681_s14, %s681_s14 }
  0x1c   :  { %p608_p11 = scmp.ne.s32.totalorder %s681_s14, %s607_s10  ;;  %p613_p13 = scmp.lt.s32.totalorder %s607_s10, %s607_s10 }
  0x1e   :  { %p614_p0 = por %p613_p13, %p612_p12 }
  0x20   :  { %p615_p1 = pnand %p614_p0, %p608_p11 }
  0x22   :  { %618 = shalt.err (!%p615_p1)
}
  0x23   :  { %s625_s0 = smov 128   ;;  %s626_s11 = smov 8  }
  0x24   :  { %47 = dma.hbm_to_vmem [thread:$0]  %s741_s5, 4096, %s681_s14, [#allocation6], %s625_s0, %s625_s0, %s626_s11  }
  0x25   :  { %619 = dma.done.wait [#allocation4], 64  }
  0x26   :  { %620 = vsyncadd [#allocation4], 4294967232 }
  0x27   :  { %621 = dma.done.wait [#allocation6], 4096  }
  0x28   :  { %622 = vsyncadd [#allocation6], 4294963200  ;;  %v627_v1 = vmov 0   ;;  %vm79_vm0 = vcmask 1041408   ;;  %v64_v5 = vld [vmem:[%s737_s1] sm:$0xf]  ;;  %v184_v41 = vlaneseq }
  0x29   :  { %118 = vmatprep.mubr.bf16.mxu1 %v627_v1  ;;  %v480_v2 = vld.sshfl [vmem:[%s739_s3] sm:$0x33 pattern:$0x76325410]  ;;  %v526_v7 = vld [vmem:[%s738_s2 + $0x4] ss:$8 sps:$4 sm:$0xff]  }
  0x2a   :  { %v74_v3 = vcombine.high %v480_v2, %v480_v2  ;;  %v81_v4 = vsel %vm79_vm0, %v480_v2, 0  ;;  %v524_v6 = vld [vmem:[%s738_s2] ss:$8 sps:$4 sm:$0xff]   ;;  %vm75_vm1 = vcmask 31744   ;;  %vm137_vm2 = vcmask 130048  }
  0x2b   :  { %v527_v8 = vld [vmem:[#allocation5 + $0x4] ss:$8 sps:$4 sm:$0xff]   ;;  %v529_v9 = vld [vmem:[#allocation5] ss:$8 sps:$4 sm:$0xff]   ;;  %v530_v10 = vld [vmem:[#allocation5 + $0x14] ss:$8 sps:$4 sm:$0xff]  }
  0x2c   :  { %481 = vmatprep.subr.msk.bf16.mxu1 %vm79_vm0, %v74_v3  ;;  %404 = vmatprep.subr.bf16.mxu0 %v527_v8  ;;  %v532_v11 = vld [vmem:[#allocation5 + $0x10] ss:$8 sps:$4 sm:$0xff]   ;;  %v533_v12 = vld [vmem:[#allocation5 + $0x24] ss:$8 sps:$4 sm:$0xff]   ;;  %v535_v13 = vld [vmem:[#allocation5 + $0x20] ss:$8 sps:$4 sm:$0xff]  }
  0x2d   :  { %87 = vmatpush1.bf16.msra.mxu1 %v81_v4  ;;  %405 = vmatpush1.bf16.msra.mxu0 %v529_v9  ;;  %v536_v14 = vld [vmem:[#allocation5 + $0x34] ss:$8 sps:$4 sm:$0xff]   ;;  %v538_v16 = vld [vmem:[#allocation5 + $0x30] ss:$8 sps:$4 sm:$0xff]   ;;  %v539_v17 = vld [vmem:[#allocation5 + $0x44] ss:$8 sps:$4 sm:$0xff]  }
  0x2e   :  { %141 = vmatprep.subr.bf16.mxu1 %v526_v7  ;;  %406 = vmatprep.subr.bf16.mxu0 %v530_v10  ;;  %v61_v15 = vld [vmem:[#allocation3] sm:$0xf]  ;;  %v541_v18 = vld [vmem:[#allocation5 + $0x40] ss:$8 sps:$4 sm:$0xff]   ;;  %v544_v20 = vld [vmem:[#allocation5 + $0x50] ss:$8 sps:$4 sm:$0xff]  }
  0x2f   :  { %v542_v19 = vld [vmem:[#allocation5 + $0x54] ss:$8 sps:$4 sm:$0xff]   ;;  %v545_v21 = vld [vmem:[#allocation5 + $0x64] ss:$8 sps:$4 sm:$0xff]   ;;  %v547_v22 = vld [vmem:[#allocation5 + $0x60] ss:$8 sps:$4 sm:$0xff]  }
  0x30   :  { %482 = vmatmul.mubr.msk.bf16.vlgmr.msra.gmra.mrb[0].mxu1 %vm75_vm1, %v64_v5  ;;  %v548_v23 = vld [vmem:[#allocation5 + $0x74] ss:$8 sps:$4 sm:$0xff]   ;;  %v550_v24 = vld [vmem:[#allocation5 + $0x70] ss:$8 sps:$4 sm:$0xff]   ;;  %v551_v25 = vld [vmem:[#allocation5 + $0x84] ss:$8 sps:$4 sm:$0xff]  }
  0x31   :  { %142 = vmatpush1.bf16.msra.mxu1 %v524_v6  ;;  %173 = vmatprep.mubr.bf16.mxu1 %v627_v1  ;;  %v553_v26 = vld [vmem:[#allocation5 + $0x80] ss:$8 sps:$4 sm:$0xff]   ;;  %v554_v27 = vld [vmem:[#allocation5 + $0x94] ss:$8 sps:$4 sm:$0xff]   ;;  %v556_v28 = vld [vmem:[#allocation5 + $0x90] ss:$8 sps:$4 sm:$0xff]  }
  0x32   :  { %407 = vmatpush1.bf16.msra.mxu0 %v532_v11  ;;  %v557_v29 = vld [vmem:[#allocation5 + $0xa4] ss:$8 sps:$4 sm:$0xff]   ;;  %v559_v30 = vld [vmem:[#allocation5 + $0xa0] ss:$8 sps:$4 sm:$0xff]   ;;  %v560_v31 = vld [vmem:[#allocation5 + $0xb4] ss:$8 sps:$4 sm:$0xff]  }
  0x33   :  { %408 = vmatprep.subr.bf16.mxu0 %v533_v12  ;;  %v562_v32 = vld [vmem:[#allocation5 + $0xb0] ss:$8 sps:$4 sm:$0xff]   ;;  %v563_v33 = vld [vmem:[#allocation5 + $0xc4] ss:$8 sps:$4 sm:$0xff]   ;;  %v565_v34 = vld [vmem:[#allocation5 + $0xc0] ss:$8 sps:$4 sm:$0xff]  }
  0x34   :  { %v566_v35 = vld [vmem:[#allocation5 + $0xd4] ss:$8 sps:$4 sm:$0xff]   ;;  %v568_v36 = vld [vmem:[#allocation5 + $0xd0] ss:$8 sps:$4 sm:$0xff]   ;;  %v569_v37 = vld [vmem:[#allocation5 + $0xe4] ss:$8 sps:$4 sm:$0xff]  }
  0x35   :  { %v571_v38 = vld [vmem:[#allocation5 + $0xe0] ss:$8 sps:$4 sm:$0xff]   ;;  %v572_v39 = vld [vmem:[#allocation5 + $0xf4] ss:$8 sps:$4 sm:$0xff]   ;;  %v574_v40 = vld [vmem:[#allocation5 + $0xf0] ss:$8 sps:$4 sm:$0xff]  }
  0x36   :  { %409 = vmatpush1.bf16.msra.mxu0 %v535_v13  ;;  %v185_v42 = vshrl.u32 %v184_v41, 7  ;;  %v182_v48 = vld [vmem:[%s740_s4] sm:$0x3]  ;;  %vm472_vm3 = vcmask 7168  }
  0x37   :  { %410 = vmatprep.subr.bf16.mxu0 %v536_v14  ;;  %v232_v0 = vld [vmem:[%s742_s6] sm:$0x3] }
  0x38   :  { %485 = vmatmul.mubr.msk.bf16.vlgmr.msra.gmra.mrb[4].mxu1 %vm137_vm2, %v61_v15  ;;  %v186_v47 = vsub.s32 0, %v185_v42  ;;  %v190_v49 = vsub.s32 1, %v185_v42  ;;  %v447_v3 = vld [vmem:[%s743_s7] sm:$0x3] }
  0x3a   :  { %411 = vmatpush1.bf16.msra.mxu0 %v538_v16  ;;  %v187_v50 = vrot.slane %v182_v48, %v186_v47  ;;  %v191_v52 = vrot.slane %v182_v48, %v190_v49  ;;  %v237_v1 = vrot.slane %v232_v0, %v186_v47  ;;  %v241_v2 = vrot.slane %v232_v0, %v190_v49 }
  0x3b   :  { %412 = vmatprep.subr.bf16.mxu0 %v539_v17  ;;  %v452_v7 = vrot.slane %v447_v3, %v186_v47  ;;  %v456_v10 = vrot.slane %v447_v3, %v190_v49  ;;  %v518_v17 = vld [vmem:[#allocation2] ss:$0 sm:$0xff] }
  0x3e   :  { %413 = vmatpush1.bf16.msra.mxu0 %v541_v18 }
  0x3f   :  { %414 = vmatprep.subr.bf16.mxu0 %v542_v19 }
  0x42   :  { %415 = vmatpush1.bf16.msra.mxu0 %v544_v20 }
  0x43   :  { %416 = vmatprep.subr.bf16.mxu0 %v545_v21 }
  0x46   :  { %417 = vmatpush1.bf16.msra.mxu0 %v547_v22 }
  0x47   :  { %418 = vmatprep.subr.bf16.mxu0 %v548_v23 }
  0x4a   :  { %419 = vmatpush1.bf16.msra.mxu0 %v550_v24 }
  0x4b   :  { %420 = vmatprep.subr.bf16.mxu0 %v551_v25 }
  0x4e   :  { %421 = vmatpush1.bf16.msra.mxu0 %v553_v26 }
  0x4f   :  { %422 = vmatprep.subr.bf16.mxu0 %v554_v27 }
  0x52   :  { %423 = vmatpush1.bf16.msra.mxu0 %v556_v28 }
  0x53   :  { %424 = vmatprep.subr.bf16.mxu0 %v557_v29 }
  0x56   :  { %425 = vmatpush1.bf16.msra.mxu0 %v559_v30 }
  0x57   :  { %426 = vmatprep.subr.bf16.mxu0 %v560_v31 }
  0x5a   :  { %427 = vmatpush1.bf16.msra.mxu0 %v562_v32 }
  0x5b   :  { %428 = vmatprep.subr.bf16.mxu0 %v563_v33 }
  0x5e   :  { %429 = vmatpush1.bf16.msra.mxu0 %v565_v34 }
  0x5f   :  { %430 = vmatprep.subr.bf16.mxu0 %v566_v35 }
  0x62   :  { %431 = vmatpush1.bf16.msra.mxu0 %v568_v36 }
  0x63   :  { %432 = vmatprep.subr.bf16.mxu0 %v569_v37 }
  0x66   :  { %433 = vmatpush1.bf16.msra.mxu0 %v571_v38 }
  0x67   :  { %434 = vmatprep.subr.bf16.mxu0 %v572_v39 }
  0x6a   :  { %435 = vmatpush1.bf16.msra.mxu0 %v574_v40 }
 0x103   :  { %v120_v43 = vpop.f32.mrb[0].mxu1 }
 0x104   :  { %v122_v44 = vpop.f32.mrb[1].mxu1 }
 0x105   :  { %v124_v45 = vpop.f32.mrb[2].mxu1 }
 0x106   :  { %v125_v46 = vpop.f32.mrb[3].mxu1 }
 0x10b   :  { %v175_v51 = vpop.f32.mrb[4].mxu1 }
 0x10c   :  { %v176_v53 = vadd.f32 %v175_v51, %v120_v43  ;;  %v177_v54 = vpop.f32.mrb[5].mxu1 }
 0x10d   :  { %v178_v55 = vadd.f32 %v177_v54, %v122_v44  ;;  %v179_v56 = vpop.f32.mrb[6].mxu1 }
 0x10e   :  { %v194_v57 = vadd.f32 %v187_v50, %v176_v53  ;;  %v180_v58 = vpop.f32.mrb[7].mxu1 }
 0x10f   :  { %v195_v59 = vadd.f32 %v191_v52, %v178_v55 }
 0x110   :  { %v196_v60 = vmax.f32 %v194_v57, 0.0 }
 0x111   :  { %v197_v61 = vmax.f32 %v195_v59, 0.0 }
 0x112   :  { %v198_v63 = vpack.c.bf16 %v196_v60, %v196_v60 }
 0x113   :  { %v199_v62 = vpack.c.bf16 %v197_v61, %v197_v61 }
 0x115   :  { %436 = vmatprep.mubr.bf16.mxu0 %v199_v62 }
 0x116   :  { %437 = vmatmul.mubr.bf16.vlgmr.msra.gmra.mrb[0].mxu0 %v198_v63 }
 0x1e9   :  { %v438_v4 = vpop.f32.mrb[0].mxu0 }
 0x1ea   :  { %v439_v5 = vadd.f32 %v438_v4, %v237_v1  ;;  %v440_v6 = vpop.f32.mrb[1].mxu0 }
 0x1eb   :  { %v441_v8 = vadd.f32 %v440_v6, %v241_v2  ;;  %v442_v9 = vpop.f32.mrb[2].mxu0 }
 0x1ec   :  { %v445_v11 = vmax.f32 %v439_v5, 0.0  ;;  %v443_v12 = vpop.f32.mrb[3].mxu0 }
 0x1ed   :  { %v446_v13 = vmax.f32 %v441_v8, 0.0 }
 0x1ee   :  { %v459_v14 = vmul.f32 %v452_v7, %v445_v11 }
 0x1ef   :  { %v460_v15 = vmul.f32 %v456_v10, %v446_v13 }
 0x1f1   :  { %v461_v16 = vadd.f32 %v460_v15, %v459_v14 }
 0x1f3   :  { %462 = vadd.xlane.f32.xlu0 %v461_v16 }
 0x280   :  { %v463_v18 = vpop.xlane.xlu0 %462 }
 0x281   :  { %v471_v19 = vadd.f32 %v518_v17, %v463_v18 }
 0x283   :  { %473 = vst.msk [vmem:[%s745_s9] sm:$0xff] %vm472_vm3, %v471_v19 }
 0x284   :  { %478 = vsyncpa [#allocation4], 1 }
 0x285   :  { %479 = vsyncpa [#allocation6], 1 }

</bundles_post_ra>
